<compile_context>
chip_gen: v7x
topology: tpu7x:2x2x1
jax: 0.10.0
libtpu: 0.0.40
codegen_flags: <defaults>
</compile_context>

<pallas_src>
import functools

import jax
import jax.numpy as jnp
import numpy as np
from jax.experimental import pallas as pl
from jax.experimental.pallas import tpu as pltpu


# ----------------------------------------------------------------------------
# Parameter setup (matches PositionalEncoding.__init__ exactly, vectorized)
# ----------------------------------------------------------------------------
def make_positional_encoding(input_size: int, input_length: int) -> jnp.ndarray:
    d = input_size
    k = np.arange(input_length, dtype=np.float64)[:, None]          # (L, 1)
    i = np.arange(d, dtype=np.float64)[None, :]                     # (1, D)
    even = (np.arange(d) % 2 == 0)[None, :]
    # even i: sin(k / 10000 ** (i / d)); odd i: cos(k / 10000 ** ((i - 1) / d))
    sin_arg = k / (10000.0 ** (i / d))
    cos_arg = k / (10000.0 ** ((i - 1.0) / d))
    pe = np.where(even, np.sin(sin_arg), np.cos(cos_arg))
    return jnp.asarray(pe, dtype=jnp.float32)                        # (L, D)


# ----------------------------------------------------------------------------
# Tiling / VMEM budget
# ----------------------------------------------------------------------------
_VMEM_LIMIT_BYTES = 48 * 1024 * 1024     # safe on v5e/v6e (128 MiB) and v7x (64 MiB)
_BLOCK_BUDGET_BYTES = 40 * 1024 * 1024   # budget for all double-buffered blocks
_BLOCK_CAP_BYTES = 8 * 1024 * 1024       # per-array block cap (amortizes step cost)


def _per_block_bytes(num_big_arrays: int) -> int:
    """Per-array block target given how many full-size arrays are blocked."""
    return min(_BLOCK_CAP_BYTES, _BLOCK_BUDGET_BYTES // (2 * num_big_arrays))


def _choose_tiles(batch: int, n: int, itemsize: int, per_block_bytes: int):
    """Pick (tb, tn) so one block <= per_block_bytes and the last two dims are
    multiples of (8, 128) or equal to the full array dims."""
    if 8 * n * itemsize <= per_block_bytes or n <= 128:
        # Full rows fit in a block: tile only the batch axis.
        tn = n
        rows = max(1, per_block_bytes // max(n * itemsize, 1))
        if rows >= batch:
            tb = batch
        else:
            tb = min(batch, max(8, (rows // 8) * 8))
    else:
        # Even an 8-row slab of full rows is too big: tile the lane axis too.
        tb = batch if batch <= 8 else 8
        lanes = max(1, per_block_bytes // (tb * itemsize))
        tn = min(n, max(128, (lanes // 128) * 128))
    # Prefer >= 2 batch blocks (v7x: lets the parallel axis use both cores).
    if tb == batch and batch >= 16:
        tb = max(8, ((batch // 2) // 8) * 8)
    return tb, tn


# ----------------------------------------------------------------------------
# Kernels (operate on lane-dense (rows, L*D) blocks)
# ----------------------------------------------------------------------------
def _keep_mask(raw_bits, threshold):
    """Keep iff the low 24 bits of the random word are >= threshold."""
    mask24 = jnp.array(0x00FFFFFF, dtype=raw_bits.dtype)
    bits24 = (raw_bits & mask24).astype(jnp.int32)
    return bits24 >= jnp.int32(threshold)


def _add_pe_kernel(x_ref, pe_ref, o_ref):
    # x_ref: (TB, TN) block; pe_ref: (1, TN) -> broadcast add over rows.
    o_ref[...] = x_ref[...] + pe_ref[...]


def _add_pe_dropout_prng_kernel(x_ref, pe_ref, seed_ref, o_ref, *,
                                threshold, scale):
    # Distinct PRNG stream per grid step; mask is generated in-kernel, so the
    # only HBM traffic is 1 read (x) + 1 write (out) per element.
    step = pl.program_id(0) * pl.num_programs(1) + pl.program_id(1)
    pltpu.prng_seed(seed_ref[0] + step)
    raw = pltpu.prng_random_bits(x_ref.shape)
    keep = _keep_mask(raw, threshold)
    val = x_ref[...] + pe_ref[...]
    o_ref[...] = jnp.where(keep, val * jnp.float32(scale),
                           jnp.float32(0.0)).astype(o_ref.dtype)


def _add_pe_dropout_bits_kernel(x_ref, pe_ref, bits_ref, o_ref, *,
                                threshold, scale):
    # Fallback: raw uint32 bits are shipped in and thresholded in-kernel
    # (no extra shift/convert pass outside the kernel).
    keep = _keep_mask(bits_ref[...], threshold)
    val = x_ref[...] + pe_ref[...]
    o_ref[...] = jnp.where(keep, val * jnp.float32(scale),
                           jnp.float32(0.0)).astype(o_ref.dtype)


# ----------------------------------------------------------------------------
# In-kernel PRNG capability probe (runs once; real TPU -> True)
# ----------------------------------------------------------------------------
_PRNG_SUPPORTED = None


def _prng_probe_kernel(seed_ref, o_ref):
    pltpu.prng_seed(seed_ref[0])
    raw = pltpu.prng_random_bits(o_ref.shape)
    o_ref[...] = (raw & jnp.array(0x00FFFFFF, dtype=raw.dtype)).astype(jnp.int32)


def _in_kernel_prng_supported() -> bool:
    global _PRNG_SUPPORTED
    if _PRNG_SUPPORTED is None:
        try:
            out = pl.pallas_call(
                _prng_probe_kernel,
                out_shape=jax.ShapeDtypeStruct((8, 128), jnp.int32),
                in_specs=[pl.BlockSpec(memory_space=pltpu.MemorySpace.SMEM)],
            )(jnp.array([0], dtype=jnp.int32))
            jax.block_until_ready(out)
            _PRNG_SUPPORTED = True
        except Exception:
            _PRNG_SUPPORTED = False
    return _PRNG_SUPPORTED


# ----------------------------------------------------------------------------
# Wrapper
# ----------------------------------------------------------------------------
def positional_encoding_forward(inputs, pe, *, p=0.1, deterministic=True,
                                seed=0, use_in_kernel_rng=None):
    """inputs: (B, L, D) float32, pe: (L, D) float32."""
    B, L, D = inputs.shape
    assert pe.shape == (L, D)
    N = L * D
    itemsize = jnp.dtype(inputs.dtype).itemsize

    # Lane-dense flatten (contiguous reshape, free at the XLA level).
    x2 = inputs.reshape(B, N)
    pe2 = pe.reshape(1, N).astype(inputs.dtype)

    dropout = (not deterministic) and p > 0.0
    if dropout and use_in_kernel_rng is None:
        use_in_kernel_rng = _in_kernel_prng_supported()

    num_big = 3 if (dropout and not use_in_kernel_rng) else 2   # x(+bits)+out
    tb, tn = _choose_tiles(B, N, itemsize, _per_block_bytes(num_big))
    grid = (pl.cdiv(B, tb), pl.cdiv(N, tn))

    x_spec = pl.BlockSpec((tb, tn), lambda i, j: (i, j))
    pe_spec = pl.BlockSpec((1, tn), lambda i, j: (0, j))
    out_spec = pl.BlockSpec((tb, tn), lambda i, j: (i, j))
    out_shape = jax.ShapeDtypeStruct((B, N), inputs.dtype)

    compiler_params = pltpu.CompilerParams(
        dimension_semantics=("parallel", "parallel"),
        vmem_limit_bytes=_VMEM_LIMIT_BYTES,
    )
    nbytes = B * N * itemsize
    cost = pl.CostEstimate(flops=B * N, transcendentals=0,
                           bytes_accessed=2 * nbytes + N * itemsize)

    if not dropout:
        out2 = pl.pallas_call(
            _add_pe_kernel,
            out_shape=out_shape,
            grid=grid,
            in_specs=[x_spec, pe_spec],
            out_specs=out_spec,
            compiler_params=compiler_params,
            cost_estimate=cost,
        )(x2, pe2)
        return out2.reshape(B, L, D)

    # TODO(synk): dropout uses JAX/TPU RNG streams, so it cannot bit-match
    #             torch's RNG; statistics (p, 1/(1-p) inverted scaling) match.
    threshold = min(int(round(p * float(1 << 24))), (1 << 24) - 1)
    scale = 1.0 / (1.0 - p)

    if use_in_kernel_rng:
        seed_arr = jnp.asarray([seed], dtype=jnp.int32)
        seed_spec = pl.BlockSpec(memory_space=pltpu.MemorySpace.SMEM)
        out2 = pl.pallas_call(
            functools.partial(_add_pe_dropout_prng_kernel,
                              threshold=threshold, scale=scale),
            out_shape=out_shape,
            grid=grid,
            in_specs=[x_spec, pe_spec, seed_spec],
            out_specs=out_spec,
            compiler_params=compiler_params,
            cost_estimate=cost,
        )(x2, pe2, seed_arr)
    else:
        # Fallback only for environments without the in-kernel TPU PRNG.
        bits = jax.random.bits(jax.random.PRNGKey(seed), (B, N),
                               dtype=jnp.uint32)
        out2 = pl.pallas_call(
            functools.partial(_add_pe_dropout_bits_kernel,
                              threshold=threshold, scale=scale),
            out_shape=out_shape,
            grid=grid,
            in_specs=[x_spec, pe_spec, x_spec],   # bits tiled like x
            out_specs=out_spec,
            compiler_params=compiler_params,
            cost_estimate=cost,
        )(x2, pe2, bits)
    return out2.reshape(B, L, D)


# ----------------------------------------------------------------------------
# Main
# ----------------------------------------------------------------------------
if __name__ == "__main__":
    B, L, D = 2, 8, 32          # batch, input_length, input_size

    key = jax.random.PRNGKey(0)
    x = jax.random.normal(key, (B, L, D), dtype=jnp.float32)
    pe = make_positional_encoding(input_size=D, input_length=L)
    ref = np.asarray(x) + np.asarray(pe)[None, :, :]

    # Eval-mode forward (dropout is identity) -- matches module.eval().
    out = positional_encoding_forward(x, pe, deterministic=True)
    out = jax.block_until_ready(out)
    np.testing.assert_allclose(np.asarray(out), ref, rtol=1e-6, atol=1e-6)

    # Training-mode forward (inverted dropout, p=0.1).
    p = 0.1
    out_train = positional_encoding_forward(
        x, pe, p=p, deterministic=False, seed=1234)
    out_train = jax.block_until_ready(out_train)
    assert out_train.shape == (B, L, D)

    # Every surviving element must equal (x + pe) / (1 - p).
    ot = np.asarray(out_train)
    kept = ot != 0.0
    np.testing.assert_allclose(ot[kept], (ref / (1.0 - p))[kept],
                               rtol=1e-5, atol=1e-5)

    print("KERNEL_OK")
</pallas_src>

<mosaic_0001>
module attributes {stable_mosaic.version = 11 : i64} {
  func.func @_add_pe_kernel(%arg0: i32, %arg1: i32, %arg2: memref<2x256xf32, #tpu.memory_space<vmem>>, %arg3: memref<1x256xf32, #tpu.memory_space<vmem>>, %arg4: memref<2x256xf32, #tpu.memory_space<vmem>>) attributes {dimension_semantics = [#tpu.dimension_semantics<parallel>, #tpu.dimension_semantics<parallel>], iteration_bounds = array<i64: 1, 1>, scalar_prefetch = 0 : i64, scratch_operands = 0 : i64, tpu.core_type = #tpu.core_type<tc>, window_params = [{transform_indices = @transform_0, window_bounds = array<i64: 2, 256>}, {transform_indices = @transform_1, window_bounds = array<i64: 1, 256>}, {transform_indices = @transform_2, window_bounds = array<i64: 2, 256>}]} {
    %c0 = arith.constant 0 : index
    %c0_0 = arith.constant 0 : index
    %0 = vector.load %arg2[%c0, %c0_0] : memref<2x256xf32, #tpu.memory_space<vmem>>, vector<2x256xf32>
    %c0_1 = arith.constant 0 : index
    %c0_2 = arith.constant 0 : index
    %1 = vector.load %arg3[%c0_1, %c0_2] : memref<1x256xf32, #tpu.memory_space<vmem>>, vector<1x256xf32>
    %2 = vector.broadcast %1 : vector<1x256xf32> to vector<2x256xf32>
    %3 = arith.addf %0, %2 : vector<2x256xf32>
    %c0_3 = arith.constant 0 : index
    %c0_4 = arith.constant 0 : index
    %4 = vector.load %arg4[%c0_3, %c0_4] : memref<2x256xf32, #tpu.memory_space<vmem>>, vector<2x256xf32>
    tpu.vector_store %arg4[%c0_3, %c0_4], %3 {strides = array<i32>} : memref<2x256xf32, #tpu.memory_space<vmem>>, vector<2x256xf32>,
    return
  }
  func.func @transform_0(%arg0: i32, %arg1: i32) -> (i32, i32) {
    %c0_i32 = arith.constant 0 : i32
    return %arg0, %arg1 : i32, i32
  }
  func.func @transform_1(%arg0: i32, %arg1: i32) -> (i32, i32) {
    %c0_i32 = arith.constant 0 : i32
    %c0_i32_0 = arith.constant 0 : i32
    return %c0_i32, %arg1 : i32, i32
  }
  func.func @transform_2(%arg0: i32, %arg1: i32) -> (i32, i32) {
    %c0_i32 = arith.constant 0 : i32
    return %arg0, %arg1 : i32, i32
  }
}

</mosaic_0001>

<bundles_post_ra>
// kernel: tpu_custom_call.1
= control target key start
LH: loop header
LB: loop body
LE: loop exit
PB: predicated region body
PF: predicated region fallthrough
CT: control target
= control target key end

     0   :  { %7 = vsyncpa [#allocation3], 0  ;;  %s157_s0 = inlined_call_operand.hbm [shape: f32[2,256], index: 0, kind: input, shape index: {}]   ;;  %s158_s1 = inlined_call_operand.vmem [shape: f32[1,256], index: 1, kind: input, shape index: {}]   ;;  %s159_s2 = inlined_call_operand.hbm [shape: f32[2,256], index: 2, kind: output, shape index: {}]  }
   0x1   :  { %8 = vsyncpa [#allocation4], 0  ;;  %s112_s9 = smov [#allocation2]   ;;  %s64_s13 = scalar_lea.hbm %s157_s0, 64 }
   0x2   :  { %s15_s10 = sshll.u32 %s112_s9, 4  ;;  %p65_p0 = scmp.ne.s32.totalorder %s157_s0, %s64_s13  ;;  %s16_s10 = int_to_ptr.vmem [resolvable:$true] %s15_s10 }
   0x3   :  { %p68_p1 = scmp.lt.u32.totalorder %s64_s13, %s157_s0 }
   0x5   :  { %p70_p2 = pnand %p68_p1, %p65_p0 }
   0x7   :  { %73 = shalt.err (!%p70_p2)
}
   0x8   :  { %s74_s18 = scalar_lea.vmem %s16_s10, 64  ;;  %p79_p4 = scmp.lt.s32.totalorder %s16_s10, %s16_s10 }
   0x9   :  { %p75_p3 = scmp.ne.s32.totalorder %s16_s10, %s74_s18  ;;  %p80_p5 = scmp.lt.s32.totalorder %s74_s18, %s74_s18 }
   0xb   :  { %p81_p6 = por %p80_p5, %p79_p4 }
   0xd   :  { %p82_p7 = pnand %p81_p6, %p75_p3 }
   0xf   :  { %85 = shalt.err (!%p82_p7)
}
  0x10   :  { %18 = dma.hbm_to_vmem [thread:$0]  %s157_s0, 64, %s16_s10, [#allocation3]  }
  0x11   :  { %108 = dma.done.wait [#allocation3], 64  }
  0x12   :  { %109 = vsyncadd [#allocation3], 4294967232  ;;  %v27_v0 = vlaneseq  ;;  %v113_v1 = vmov 1983009808   ;;  %v25_v7 = vld [vmem:[%s158_s1] sm:$0x3] }
  0x13   :  { %v37_v2 = vunpack.c.l.s4 %v113_v1  ;;  %v24_v12 = vld [vmem:[#allocation2] sm:$0xf]  ;;  %s114_s23 = smov [#allocation5]  }
  0x14   :  { %v28_v3 = vshrl.u32 %v27_v0, 7  ;;  %s52_s0 = sshll.u32 %s114_s23, 4  ;;  %s53_s0 = int_to_ptr.vmem [resolvable:$true] %s52_s0 }
  0x15   :  { %v38_v6 = vunpack.c.0.s8 %v37_v2  ;;  %s86_s24 = scalar_lea.vmem %s53_s0, 64  ;;  %p91_p9 = scmp.lt.s32.totalorder %s53_s0, %s53_s0 }
  0x16   :  { %v29_v4 = vsub.s32 0, %v28_v3  ;;  %v33_v5 = vsub.s32 1, %v28_v3  ;;  %p87_p8 = scmp.ne.s32.totalorder %s53_s0, %s86_s24  ;;  %p92_p10 = scmp.lt.s32.totalorder %s86_s24, %s86_s24 }
  0x17   :  { %v41_v10 = vsub.s32 %v38_v6, %v28_v3 }
  0x18   :  { %v30_v8 = vrot.slane %v25_v7, %v29_v4  ;;  %v34_v9 = vrot.slane %v25_v7, %v33_v5  ;;  %p93_p11 = por %p92_p10, %p91_p9 }
  0x1a   :  { %v35_v11 = vcombine.low %v30_v8, %v34_v9  ;;  %p94_p12 = pnand %p93_p11, %p87_p8 }
  0x1c   :  { %v42_v13 = vrot.slane %v35_v11, %v41_v10 }
  0x1e   :  { %v44_v14 = vadd.f32 %v42_v13, %v24_v12 }
  0x20   :  { %45 = vst [vmem:[#allocation5] sm:$0xf] %v44_v14 }
  0x21   :  { %97 = shalt.err (!%p94_p12)
}
  0x22   :  { %s98_s26 = scalar_lea.hbm %s159_s2, 64 }
  0x23   :  { %p99_p13 = scmp.ne.s32.totalorder %s159_s2, %s98_s26  ;;  %p102_p0 = scmp.lt.u32.totalorder %s98_s26, %s159_s2 }
  0x25   :  { %p104_p1 = pnand %p102_p0, %p99_p13 }
  0x27   :  { %107 = shalt.err (!%p104_p1)
}
  0x28   :  { %55 = dma.vmem_to_hbm [thread:$0]  %s53_s0, 64, %s159_s2, [#allocation4]  }
  0x29   :  { %110 = dma.done.wait [#allocation4], 64  }
  0x2a   :  { %111 = vsyncadd [#allocation4], 4294967232 }
  0x2b   :  { %59 = vsyncpa [#allocation3], 1 }
  0x2c   :  { %60 = vsyncpa [#allocation4], 1 }

</bundles_post_ra>
